<compile_context>
chip_gen: v7x
topology: tpu7x:2x2x1
jax: 0.10.0
libtpu: 0.0.40
codegen_flags: <defaults>
</compile_context>

<pallas_src>
import functools

import jax
import jax.numpy as jnp
from jax import lax
from jax.experimental import pallas as pl
from jax.experimental.pallas import tpu as pltpu


def _round_up(x, m):
    return ((x + m - 1) // m) * m


# --------------------------------------------------------------------------
# Kernel: row-wise logsumexp of (q @ k^T) / T over all non-self columns.
# --------------------------------------------------------------------------
def _rowwise_lse_kernel(q_ref, k_ref, out_ref, m_ref, l_ref, *,
                        inv_t, n_valid, n_pad, fixed_stabilizer):
    i = pl.program_id(0)          # row tile   (parallel)
    j = pl.program_id(1)          # column tile (reduction carried in scratch)
    last_j = pl.num_programs(1) - 1
    has_pad = n_pad != n_valid    # static Python bool

    @pl.when(j == 0)
    def _init():
        l_ref[...] = jnp.zeros_like(l_ref)
        if not fixed_stabilizer:
            m_ref[...] = jnp.full_like(m_ref, -jnp.inf)

    # Logits tile on the MXU: contract the feature (lane) axis of both
    # operands directly, f32 accumulation.
    z = lax.dot_general(
        q_ref[...], k_ref[...],
        dimension_numbers=(((1,), (1,)), ((), ())),
        preferred_element_type=jnp.float32,
    ) * inv_t                                                   # (bq, bk) f32
    bq, bk = z.shape

    if fixed_stabilizer:
        # Features are L2-normalized -> z <= 1/T.  Constant stabilizer: no
        # per-tile cross-lane max, no rescale of l, no carried max dependency.
        p = jnp.exp(z - inv_t)
        l_prev = l_ref[...]
    else:
        # Online softmax (all f32).  Padded key columns (zero vectors, z = 0)
        # may enter the max, but the reference's row max includes the
        # diagonal z_rr = |f_r|^2/T >= 0, so the stabilizer is unchanged.
        m_prev = m_ref[...]
        m_new = jnp.maximum(m_prev, jnp.max(z, axis=1, keepdims=True))
        p = jnp.exp(z - m_new)
        l_prev = jnp.exp(m_prev - m_new) * l_ref[...]
        m_ref[...] = m_new

    is_diag = i == j
    if has_pad:
        is_special = jnp.logical_or(is_diag, j == last_j)
    else:
        is_special = is_diag

    # Common path (vast majority of tiles): no iota / compare / where work.
    @pl.when(jnp.logical_not(is_special))
    def _plain_tile():
        l_ref[...] = l_prev + jnp.sum(p, axis=1, keepdims=True)

    # Special tiles only: drop the global diagonal (self-similarity) and/or
    # zero-padded key columns via an exact masked sum.
    @pl.when(is_special)
    def _masked_tile():
        rows = lax.broadcasted_iota(jnp.int32, (bq, bk), 0)
        cols = lax.broadcasted_iota(jnp.int32, (bq, bk), 1)
        # Square, aligned blocks: on i == j tiles the local diagonal is the
        # global diagonal.
        drop = jnp.logical_and(is_diag, rows == cols)
        if has_pad:
            drop = jnp.logical_or(drop, cols + j * bk >= n_valid)
        l_ref[...] = l_prev + jnp.sum(jnp.where(drop, 0.0, p),
                                      axis=1, keepdims=True)

    @pl.when(j == last_j)
    def _finalize():
        stab = inv_t if fixed_stabilizer else m_ref[...]
        lse = stab + jnp.log(l_ref[...])                        # (bq, 1)
        # Lane-dense (bq, 128) store; the wrapper reads lane 0.
        out_ref[...] = jnp.broadcast_to(lse, out_ref.shape)


def _rowwise_lse(feats_flat, *, temperature, block_size, compute_dtype,
                 assume_normalized=False,
                 vmem_budget_bytes=40 * 1024 * 1024):
    """Per-row logsumexp_{c != r} of (f @ f^T)/T via the Pallas kernel."""
    n, d = feats_flat.shape
    itemsize = jnp.dtype(compute_dtype).itemsize
    # Sublane multiple for the block row dim: 8 for f32, 16 for bf16, 32 for
    # 8-bit dtypes (review: bf16 packs two rows per sublane).
    sub = {4: 8, 2: 16, 1: 32}.get(itemsize, 8)

    blk = _round_up(min(int(block_size), _round_up(n, sub)), sub)

    def vmem_est(b):
        return (2 * 2 * b * d * itemsize      # q + k tiles, double-buffered
                + 2 * b * 128 * 4             # output tile, double-buffered
                + 3 * b * b * 4               # z / p / temps (f32)
                + 4 * b * 4)                  # m / l scratch
    # Keep the estimate within a budget that is safe on v7x (64 MiB physical
    # VMEM) as well as v5e / v6e.
    while blk > sub and vmem_est(blk) > vmem_budget_bytes:
        blk = _round_up(max(blk // 2, sub), sub)

    n_pad = _round_up(n, blk)
    n_tiles = n_pad // blk

    x = feats_flat.astype(compute_dtype)
    if n_pad != n:
        x = jnp.pad(x, ((0, n_pad - n), (0, 0)))

    kernel = functools.partial(
        _rowwise_lse_kernel,
        inv_t=1.0 / float(temperature),
        n_valid=n, n_pad=n_pad,
        fixed_stabilizer=bool(assume_normalized))

    cost = pl.CostEstimate(
        flops=2 * n_pad * n_pad * d,
        transcendentals=n_pad * n_pad,
        bytes_accessed=(n_tiles * n_pad * d + n_pad * d) * itemsize
        + n_pad * 128 * 4)

    vmem_limit = int(min(56 * 1024 * 1024,
                         max(32 * 1024 * 1024, 2 * vmem_est(blk))))

    out = pl.pallas_call(
        kernel,
        out_shape=jax.ShapeDtypeStruct((n_pad, 128), jnp.float32),
        grid_spec=pltpu.PrefetchScalarGridSpec(
            num_scalar_prefetch=0,
            grid=(n_tiles, n_tiles),
            in_specs=[
                pl.BlockSpec((blk, d), lambda i, j: (i, 0)),   # query (resident)
                pl.BlockSpec((blk, d), lambda i, j: (j, 0)),   # key (streamed)
            ],
            out_specs=pl.BlockSpec((blk, 128), lambda i, j: (i, 0)),
            scratch_shapes=[
                pltpu.VMEM((blk, 1), jnp.float32),   # running row max
                pltpu.VMEM((blk, 1), jnp.float32),   # running sum(exp)
            ],
        ),
        # Row axis parallel, column axis is the carried reduction.  On v7x a
        # CORE_PARALLEL row axis (or an explicit core_map split) could shard
        # row tiles across the two TensorCores; "parallel" is kept here as
        # the portable, known-good setting for v5e/v6e/v7x.
        compiler_params=pltpu.CompilerParams(
            dimension_semantics=("parallel", "arbitrary"),
            vmem_limit_bytes=vmem_limit),
        cost_estimate=cost,
    )(x, x)
    return out[:n, 0]


# --------------------------------------------------------------------------
# Wrapper: label bookkeeping + final reduction (cheap, plain JAX).
# --------------------------------------------------------------------------
def _category_iou(qry_labels, key_labels):
    """IOU between category sets (matches ContrastLoss._category_iou)."""
    q, qc = qry_labels.shape
    k, kc = key_labels.shape
    ql = qry_labels.reshape(q, 1, qc, 1)
    kl = key_labels.reshape(1, k, 1, kc)
    n_int = jnp.sum(jnp.equal(ql, kl), axis=(-2, -1)).astype(jnp.float32)
    n_union = kc + qc - n_int
    return n_int / n_union


def _base_similarity(labels, B):
    if labels is None:
        return jnp.eye(B, dtype=jnp.float32)
    labels = jnp.asarray(labels)
    assert labels.shape[0] == B
    if labels.ndim == 1:
        labels = labels.reshape(B, 1)
    assert labels.ndim == 2
    if labels.shape[1] == 1:
        return jnp.equal(labels, labels.T).astype(jnp.float32)
    return _category_iou(labels, labels)


def simclr_loss(feats, labels=None, *, reduction="mean", T=0.07,
                block_size=1024, compute_dtype=jnp.bfloat16,
                assume_normalized=False):
    """feats: (V, B, D). labels: None, (B,) or (B, C). Matches SimCLRLoss.forward.

    compute_dtype controls the MXU input precision for the logits (bf16
    default, f32 accumulation).  With T=0.07 bf16 logit rounding is amplified
    ~14x; pass compute_dtype=jnp.float32 for precision-sensitive use.
    assume_normalized=True is only valid for L2-normalized features.
    """
    assert feats.ndim == 3
    V, B, D = feats.shape
    assert V > 1
    N = V * B

    f = feats.astype(jnp.float32)

    # ---- label bookkeeping: O(B^2*D + N*D), no (N, D) tiled temporaries ---
    sim_b = _base_similarity(labels, B)           # (B, B)
    row_sum = jnp.sum(sim_b, axis=1)              # (B,)
    diag = jnp.diagonal(sim_b)                    # (B,)
    g = jnp.sum(f, axis=0)                        # (B, D)  sum over views
    w = sim_b @ g                                 # (B, D)

    sq_norm = jnp.sum(f * f, axis=-1)                                  # (V, B)
    a = (jnp.einsum('vbd,bd->vb', f, w) - sq_norm * diag[None, :]) / T  # (V, B)
    a_rows = a.reshape(N)                         # sum_{c != r} z[r,c]*sim[r,c]
    s_rows = jnp.broadcast_to((V * row_sum - diag)[None, :], (V, B)).reshape(N)

    # ---- Pallas kernel: the O(N^2) hot path -----------------------------
    lse = _rowwise_lse(f.reshape(N, D), temperature=T, block_size=block_size,
                       compute_dtype=compute_dtype,
                       assume_normalized=assume_normalized)

    # NOTE: matches the reference: rows with no positives (s_rows == 0) NaN.
    loss_rows = lse - a_rows / s_rows
    return jnp.mean(loss_rows) if reduction == "mean" else jnp.sum(loss_rows)


# --------------------------------------------------------------------------
# Plain-JAX reference mirroring the PyTorch forward (for validation only).
# --------------------------------------------------------------------------
def _reference_loss(feats, labels=None, *, reduction="mean", T=0.07):
    V, B, D = feats.shape
    N = V * B
    f = feats.reshape(N, D).astype(jnp.float32)
    logits = f @ f.T
    logits = logits - jnp.max(logits, axis=1, keepdims=True)
    logits = logits / T
    sim = jnp.tile(_base_similarity(labels, B), (V, V))
    mask = 1.0 - jnp.eye(N, dtype=jnp.float32)
    sim = sim * mask
    exp_logits = jnp.exp(logits) * mask
    log_prob = logits - jnp.log(jnp.sum(exp_logits, axis=1, keepdims=True))
    loss = -jnp.sum(log_prob * sim, axis=1) / jnp.sum(sim, axis=1)
    return jnp.mean(loss) if reduction == "mean" else jnp.sum(loss)


if __name__ == "__main__":
    key = jax.random.PRNGKey(0)
    kf, kl, km, kg = jax.random.split(key, 4)

    V, B, D = 2, 5, 32
    feats = jax.random.normal(kf, (V, B, D), dtype=jnp.float32)
    feats = feats / jnp.linalg.norm(feats, axis=-1, keepdims=True)
    int_labels = jax.random.randint(kl, (B,), 0, 3)
    cat_labels = jax.random.randint(km, (B, 1), 0, 4) + jnp.arange(3)[None, :]

    def check(name, got, want, atol, rtol):
        got = jax.block_until_ready(got)
        want = jax.block_until_ready(want)
        assert jnp.isfinite(got), (name, got)
        assert jnp.allclose(got, want, atol=atol, rtol=rtol), (name, got, want)

    # 1) instance discrimination (labels=None), f32, 2x2 grid with padded
    #    rows/cols (N=10 -> 16): exercises plain / diagonal / padded branches.
    check("eye/f32/tiled",
          simclr_loss(feats, None, compute_dtype=jnp.float32, block_size=8),
          _reference_loss(feats, None), 1e-4, 1e-4)

    # 2) integer labels (supervised contrastive), f32, single tile.
    check("int-labels/f32",
          simclr_loss(feats, int_labels, compute_dtype=jnp.float32),
          _reference_loss(feats, int_labels), 1e-4, 1e-4)

    # 3) multi-label category-IOU similarity, f32, sum reduction.
    check("iou/f32/sum",
          simclr_loss(feats, cat_labels, reduction="sum",
                      compute_dtype=jnp.float32),
          _reference_loss(feats, cat_labels, reduction="sum"), 1e-3, 1e-4)

    # 4) normalized-feature fast path (constant stabilizer, no online max).
    check("eye/f32/normalized",
          simclr_loss(feats, None, compute_dtype=jnp.float32, block_size=8,
                      assume_normalized=True),
          _reference_loss(feats, None), 1e-4, 1e-4)

    # 5) default bf16 MXU path, single tile (blk rounds to the bf16 sublane 16).
    check("eye/bf16",
          simclr_loss(feats, None, block_size=16),
          _reference_loss(feats, None), 1.5e-1, 2e-2)

    # 6) bf16, multi-tile grid without padding (N=48, blk=16 -> 3x3 grid).
    feats2 = jax.random.normal(kg, (2, 24, 64), dtype=jnp.float32)
    feats2 = feats2 / jnp.linalg.norm(feats2, axis=-1, keepdims=True)
    check("eye/bf16/tiled",
          simclr_loss(feats2, None, block_size=16),
          _reference_loss(feats2, None), 2e-1, 5e-2)

    print("KERNEL_OK")
</pallas_src>

<mosaic_0001>
module attributes {stable_mosaic.version = 11 : i64} {
  func.func @_rowwise_lse_kernel(%arg0: i32, %arg1: i32, %arg2: memref<8x32xf32, #tpu.memory_space<vmem>>, %arg3: memref<8x32xf32, #tpu.memory_space<vmem>>, %arg4: memref<8x128xf32, #tpu.memory_space<vmem>>, %arg5: memref<8x1xf32, #tpu.memory_space<vmem>>, %arg6: memref<8x1xf32, #tpu.memory_space<vmem>>) attributes {dimension_semantics = [#tpu.dimension_semantics<parallel>, #tpu.dimension_semantics<arbitrary>], iteration_bounds = array<i64: 2, 2>, scalar_prefetch = 0 : i64, scratch_operands = 2 : i64, tpu.core_type = #tpu.core_type<tc>, window_params = [{transform_indices = @transform_0, window_bounds = array<i64: 8, 32>}, {transform_indices = @transform_1, window_bounds = array<i64: 8, 32>}, {transform_indices = @transform_2, window_bounds = array<i64: 8, 128>}]} {
    %c0_i32 = arith.constant 0 : i32
    %0 = arith.cmpi eq, %arg1, %c0_i32 : i32
    %1 = arith.extui %0 : i1 to i32
    %c0_i32_0 = arith.constant 0 : i32
    %2 = arith.cmpi ne, %1, %c0_i32_0 : i32
    scf.if %2 {
      %cst_16 = arith.constant 0.000000e+00 : f32
      %31 = vector.broadcast %cst_16 : f32 to vector<8x1xf32>
      %c0_17 = arith.constant 0 : index
      %c0_18 = arith.constant 0 : index
      %32 = vector.load %arg6[%c0_17, %c0_18] : memref<8x1xf32, #tpu.memory_space<vmem>>, vector<8x1xf32>
      tpu.vector_store %arg6[%c0_17, %c0_18], %31 {strides = array<i32>} : memref<8x1xf32, #tpu.memory_space<vmem>>, vector<8x1xf32>,
      %cst_19 = arith.constant 0xFF800000 : f32
      %33 = vector.broadcast %cst_19 : f32 to vector<8x1xf32>
      %c0_20 = arith.constant 0 : index
      %c0_21 = arith.constant 0 : index
      %34 = vector.load %arg5[%c0_20, %c0_21] : memref<8x1xf32, #tpu.memory_space<vmem>>, vector<8x1xf32>
      tpu.vector_store %arg5[%c0_20, %c0_21], %33 {strides = array<i32>} : memref<8x1xf32, #tpu.memory_space<vmem>>, vector<8x1xf32>,
    } else {
    }
    %c0 = arith.constant 0 : index
    %c0_1 = arith.constant 0 : index
    %3 = vector.load %arg2[%c0, %c0_1] : memref<8x32xf32, #tpu.memory_space<vmem>>, vector<8x32xf32>
    %c0_2 = arith.constant 0 : index
    %c0_3 = arith.constant 0 : index
    %4 = vector.load %arg3[%c0_2, %c0_3] : memref<8x32xf32, #tpu.memory_space<vmem>>, vector<8x32xf32>
    %cst = arith.constant dense<0.000000e+00> : vector<8x8xf32>
    %5 = tpu.matmul %3, %4, %cst {dimension_numbers = #tpu.dot_dimension_numbers<[1], [1], [0], [0], [0, 0, 1, 0], [], []>} : vector<8x32xf32>, vector<8x32xf32>, vector<8x8xf32> -> vector<8x8xf32>
    %cst_4 = arith.constant 14.2857141 : f32
    %6 = vector.broadcast %cst_4 : f32 to vector<8x8xf32>
    %7 = arith.mulf %5, %6 : vector<8x8xf32>
    %c0_5 = arith.constant 0 : index
    %c0_6 = arith.constant 0 : index
    %8 = vector.load %arg5[%c0_5, %c0_6] : memref<8x1xf32, #tpu.memory_space<vmem>>, vector<8x1xf32>
    %cst_7 = arith.constant dense<0xFF800000> : vector<8xf32>
    %9 = vector.multi_reduction <maximumf>, %7, %cst_7 [1] : vector<8x8xf32> to vector<8xf32>
    %10 = vector.shape_cast %9 : vector<8xf32> to vector<8x1xf32>
    %11 = arith.maximumf %8, %10 : vector<8x1xf32>
    %12 = vector.broadcast %11 : vector<8x1xf32> to vector<8x8xf32>
    %13 = arith.subf %7, %12 : vector<8x8xf32>
    %14 = math.exp %13 : vector<8x8xf32>
    %15 = arith.subf %8, %11 : vector<8x1xf32>
    %16 = math.exp %15 : vector<8x1xf32>
    %c0_8 = arith.constant 0 : index
    %c0_9 = arith.constant 0 : index
    %17 = vector.load %arg6[%c0_8, %c0_9] : memref<8x1xf32, #tpu.memory_space<vmem>>, vector<8x1xf32>
    %18 = arith.mulf %16, %17 : vector<8x1xf32>
    %c0_10 = arith.constant 0 : index
    %c0_11 = arith.constant 0 : index
    %19 = vector.load %arg5[%c0_10, %c0_11] : memref<8x1xf32, #tpu.memory_space<vmem>>, vector<8x1xf32>
    tpu.vector_store %arg5[%c0_10, %c0_11], %11 {strides = array<i32>} : memref<8x1xf32, #tpu.memory_space<vmem>>, vector<8x1xf32>,
    %20 = arith.cmpi eq, %arg0, %arg1 : i32
    %c1_i32 = arith.constant 1 : i32
    %21 = arith.cmpi eq, %arg1, %c1_i32 : i32
    %22 = arith.ori %20, %21 : i1
    %true = arith.constant true
    %23 = arith.xori %22, %true : i1
    %24 = arith.extui %23 : i1 to i32
    %c0_i32_12 = arith.constant 0 : i32
    %25 = arith.cmpi ne, %24, %c0_i32_12 : i32
    scf.if %25 {
      %cst_16 = arith.constant dense<0.000000e+00> : vector<8xf32>
      %31 = vector.multi_reduction <add>, %14, %cst_16 [1] : vector<8x8xf32> to vector<8xf32>
      %32 = vector.shape_cast %31 : vector<8xf32> to vector<8x1xf32>
      %33 = arith.addf %18, %32 : vector<8x1xf32>
      %c0_17 = arith.constant 0 : index
      %c0_18 = arith.constant 0 : index
      %34 = vector.load %arg6[%c0_17, %c0_18] : memref<8x1xf32, #tpu.memory_space<vmem>>, vector<8x1xf32>
      tpu.vector_store %arg6[%c0_17, %c0_18], %33 {strides = array<i32>} : memref<8x1xf32, #tpu.memory_space<vmem>>, vector<8x1xf32>,
    } else {
    }
    %26 = arith.extui %22 : i1 to i32
    %c0_i32_13 = arith.constant 0 : i32
    %27 = arith.cmpi ne, %26, %c0_i32_13 : i32
    scf.if %27 {
      %31 = tpu.iota {dimensions = array<i32: 0>} : vector<8x8xi32>
      %32 = tpu.iota {dimensions = array<i32: 1>} : vector<8x8xi32>
      %33 = arith.cmpi eq, %31, %32 : vector<8x8xi32>
      %34 = vector.broadcast %20 : i1 to vector<8x8xi1>
      %35 = arith.andi %34, %33 : vector<8x8xi1>
      %c8_i32 = arith.constant 8 : i32
      %36 = arith.muli %arg1, %c8_i32 : i32
      %37 = vector.broadcast %36 : i32 to vector<8x8xi32>
      %38 = arith.addi %32, %37 : vector<8x8xi32>
      %c10_i32 = arith.constant 10 : i32
      %39 = vector.broadcast %c10_i32 : i32 to vector<8x8xi32>
      %40 = arith.cmpi sge, %38, %39 : vector<8x8xi32>
      %41 = arith.ori %35, %40 : vector<8x8xi1>
      %cst_16 = arith.constant 0.000000e+00 : f32
      %42 = vector.broadcast %cst_16 : f32 to vector<8x8xf32>
      %43 = arith.select %41, %42, %14 : vector<8x8xi1>, vector<8x8xf32>
      %cst_17 = arith.constant dense<0.000000e+00> : vector<8xf32>
      %44 = vector.multi_reduction <add>, %43, %cst_17 [1] : vector<8x8xf32> to vector<8xf32>
      %45 = vector.shape_cast %44 : vector<8xf32> to vector<8x1xf32>
      %46 = arith.addf %18, %45 : vector<8x1xf32>
      %c0_18 = arith.constant 0 : index
      %c0_19 = arith.constant 0 : index
      %47 = vector.load %arg6[%c0_18, %c0_19] : memref<8x1xf32, #tpu.memory_space<vmem>>, vector<8x1xf32>
      tpu.vector_store %arg6[%c0_18, %c0_19], %46 {strides = array<i32>} : memref<8x1xf32, #tpu.memory_space<vmem>>, vector<8x1xf32>,
    } else {
    }
    %c1_i32_14 = arith.constant 1 : i32
    %28 = arith.cmpi eq, %arg1, %c1_i32_14 : i32
    %29 = arith.extui %28 : i1 to i32
    %c0_i32_15 = arith.constant 0 : i32
    %30 = arith.cmpi ne, %29, %c0_i32_15 : i32
    scf.if %30 {
      %c0_16 = arith.constant 0 : index
      %c0_17 = arith.constant 0 : index
      %31 = vector.load %arg5[%c0_16, %c0_17] : memref<8x1xf32, #tpu.memory_space<vmem>>, vector<8x1xf32>
      %c0_18 = arith.constant 0 : index
      %c0_19 = arith.constant 0 : index
      %32 = vector.load %arg6[%c0_18, %c0_19] : memref<8x1xf32, #tpu.memory_space<vmem>>, vector<8x1xf32>
      %33 = math.log %32 : vector<8x1xf32>
      %34 = arith.addf %31, %33 : vector<8x1xf32>
      %35 = vector.shape_cast %34 : vector<8x1xf32> to vector<8x1xf32>
      %36 = vector.broadcast %35 : vector<8x1xf32> to vector<8x128xf32>
      %c0_20 = arith.constant 0 : index
      %c0_21 = arith.constant 0 : index
      %37 = vector.load %arg4[%c0_20, %c0_21] : memref<8x128xf32, #tpu.memory_space<vmem>>, vector<8x128xf32>
      tpu.vector_store %arg4[%c0_20, %c0_21], %36 {strides = array<i32>} : memref<8x128xf32, #tpu.memory_space<vmem>>, vector<8x128xf32>,
    } else {
    }
    return
  }
  func.func @transform_0(%arg0: i32, %arg1: i32) -> (i32, i32) {
    %c0_i32 = arith.constant 0 : i32
    %c0_i32_0 = arith.constant 0 : i32
    return %arg0, %c0_i32 : i32, i32
  }
  func.func @transform_1(%arg0: i32, %arg1: i32) -> (i32, i32) {
    %c0_i32 = arith.constant 0 : i32
    %c0_i32_0 = arith.constant 0 : i32
    return %arg1, %c0_i32 : i32, i32
  }
  func.func @transform_2(%arg0: i32, %arg1: i32) -> (i32, i32) {
    %c0_i32 = arith.constant 0 : i32
    %c0_i32_0 = arith.constant 0 : i32
    return %arg0, %c0_i32 : i32, i32
  }
}

</mosaic_0001>

<bundles_post_ra>
// kernel: tpu_custom_call.1
= control target key start
LH: loop header
LB: loop body
LE: loop exit
PB: predicated region body
PF: predicated region fallthrough
CT: control target
= control target key end

     0   :  { %s1170_s0 = inlined_call_operand.hbm [shape: f32[16,32], index: 0, kind: input, shape index: {}]   ;;  %s1171_s1 = inlined_call_operand.hbm [shape: f32[16,32], index: 1, kind: input, shape index: {}]   ;;  %s1172_s2 = inlined_call_operand.hbm [shape: f32[16,128], index: 2, kind: output, shape index: {}]  }
   0x1   :  { %1180 = sst [smem:[#allocation15_spill]] %s1170_s0 }
   0x2   :  { %7 = vsyncpa [#allocation5], 0 }
   0x3   :  { %9 = vsyncpa [#allocation5 + $0x1], 0 }
   0x4   :  { %10 = vsyncpa [#allocation8], 0 }
   0x5   :  { %12 = vsyncpa [#allocation8 + $0x1], 0 }
   0x6   :  { %13 = vsyncpa [#allocation6], 0 }
   0x7   :  { %15 = vsyncpa [#allocation6 + $0x1], 0  ;;  %s843_s9 = smov 0   ;;  %s845_s10 = smov 0  }
   0x8   :  { %s847_s11 = smov 0   ;;  %s849_s12 = smov 0  }
   0x9   :  { %s851_s13 = smov 0   ;;  %s853_s14 = smov 0  }
   0xa   :  { %s855_s15 = smov 0   ;;  %s857_s16 = smov 0  }
   0xb   :  { %s859_s17 = smov 0   ;;  %s861_s18 = smov 0  }
   0xc   :  { %s863_s19 = smov 0  }
   0xd LB: > { %s482_s20 = sadd.s32 4294967295, %s817_s19   ;;  %s483_s21 = sadd.s32 4294967294, %s817_s19   ;;  %s817_s19 = sphi %s863_s19, %s21_s19   ;;  %s813_s18 = sphi %s861_s18, %s1214_s18   ;;  %s809_s17 = sphi %s859_s17, %s1213_s17   ;;  %s805_s16 = sphi %s857_s16, %s1212_s16   ;;  %s801_s15 = sphi %s855_s15, %s1211_s15   ;;  %s797_s14 = sphi %s853_s14, %s1210_s14   ;;  %s793_s13 = sphi %s851_s13, %s1209_s13   ;;  %s789_s12 = sphi %s849_s12, %s1208_s12   ;;  %s785_s11 = sphi %s847_s11, %s1207_s11   ;;  %s781_s10 = sphi %s845_s10, %s1206_s10   ;;  %s777_s9 = sphi %s843_s9, %s1205_s9  }
   0xe   : > { %s33_s22 = sadd.s32 1, %s813_s18  ;;  %s40_s23 = sadd.s32 1, %s797_s14 }
   0xf   : > { %p47_p0 = scmp.ne.s32.totalorder %s797_s14, %s793_s13  ;;  %p1174_p1 = scmp.eq.s32.totalorder %s817_s19, 0 }
  0x10   : > { %p53_p2 = scmp.ne.s32.totalorder %s793_s13, %s789_s12  ;;  %p907_p3 = scmp.eq.s32.totalorder %s482_s20, 0 }
  0x11   : > { %p913_p4 = por %p1174_p1, %p47_p0  ;;  %p103_p5 = scmp.eq.s32.totalorder %s482_s20, 3 }
  0x12   : > { %p919_p6 = por %p907_p3, %p53_p2  ;;  %p109_p7 = scmp.eq.s32.totalorder %s483_s21, 3 }
  0x13   : > { %p923_p8 = por %p103_p5, %p47_p0  ;;  %p1173_p10 = scmp.lt.s32.totalorder %s817_s19, 4 }
  0x14   : > { %s1183_s26 = scalar_select %p919_p6, 1, 0 }
  0x15   : > { %s1184_s27 = scalar_select %p923_p8, 1, 0 }
  0x16   : > { %p927_p9 = por %p109_p7, %p53_p2  ;;  %s129_s29 = sand.u32 1, %s797_s14  }
  0x17   : > { %s487_s30 = sshll.u32 %s813_s18, 7  ;;  %s486_s3 = sshll.u32 %s129_s29, 3 }
  0x18   : > { %s1185_s28 = scalar_select %p927_p9, 1, 0 }
  0x19   : > { %s1187_s0 = sld [smem:[#allocation15_spill]]  ;;  %s133_s7 = scalar_lea.vmem [#allocation4], %s486_s3 }
  0x1a   : > { %1186 = sst [smem:[#allocation13_spill]] %s1185_s28  ;;  %s140_s8 = sshll.u32 %s133_s7, 4  ;;  %s947_s8 = int_to_ptr.vmem [resolvable:$true] %s140_s8 }
  0x1b   : > { %p943_p11 = pnand %p1173_p10, %p913_p4  ;;  %s130_s21 = scalar_lea.sflag [#allocation5], %s129_s29 }
  0x1d   : > { %p633_p2 = pneg %p943_p11 }
  0x1f   : > { %s937_s6 = scalar_lea.hbm %s1187_s0, %s487_s30  ;;  %s636_s4 = scalar_lea.hbm %s1187_s0, 256 }
  0x20   : > { %s631_s30 = scalar_lea.hbm %s937_s6, 128  ;;  %p637_p4 = scmp.lt.u32.totalorder %s937_s6, %s1187_s0 }
  0x21   : > { %p632_p0 = scmp.ne.s32.totalorder %s937_s6, %s631_s30  ;;  %p638_p10 = scmp.lt.u32.totalorder %s636_s4, %s631_s30 }
  0x22   : > { %p640_p12 = scmp.lt.u32.totalorder %s631_s30, %s937_s6 }
  0x23   : > { %p634_p5 = pnand %p633_p2, %p632_p0  ;;  %p639_p1 = por %p638_p10, %p637_p4 }
  0x25   : > { %p635_p7 = pneg %p634_p5  ;;  %p641_p13 = por %p640_p12, %p639_p1 }
  0x27   : > { %p642_p9 = pnand %p641_p13, %p635_p7 }
  0x29   : > { %645 = shalt.err (!%p642_p9)
}
  0x2a   : > { %s646_s29 = scalar_lea.vmem %s947_s8, 128  ;;  %s819_s25 = smov [#allocation4]  }
  0x2b   : > { %p647_p0 = scmp.ne.s32.totalorder %s947_s8, %s646_s29  ;;  %s651_s3 = sshll.u32 %s819_s25, 4  ;;  %s652_s3 = int_to_ptr.vmem [resolvable:$false] %s651_s3 }
  0x2c   : > { %s653_s5 = scalar_lea.vmem %s652_s3, 256  ;;  %p654_p6 = scmp.lt.s32.totalorder %s947_s8, %s652_s3 }
  0x2d   : > { %p649_p5 = pnand %p647_p0, %p633_p2  ;;  %p655_p10 = scmp.lt.s32.totalorder %s653_s5, %s646_s29 }
  0x2f   : > { %p650_p8 = pneg %p649_p5  ;;  %p656_p4 = por %p655_p10, %p654_p6 }
  0x31   : > { %p657_p1 = pnand %p656_p4, %p650_p8 }
  0x33   : > { %660 = shalt.err (!%p657_p1)
}
  0x34   : > { %519 = dma.hbm_to_vmem [thread:$0]  (!%p943_p11), %s937_s6, 128, %s947_s8, %s130_s21  }
  0x35   : > { %p1189_p6 = scmp.lt.s32.totalorder %s817_s19, 5  ;;  %p1190_p8 = scmp.ge.s32.totalorder %s817_s19, 1 }
  0x36   : > { %s30_s30 = sadd.s32 1, %s809_s17  ;;  %s66_s4 = sadd.s32 1, %s785_s11 }
  0x37   : > { %p980_p9 = pnand %p1190_p8, %p1189_p6  ;;  %p31_p12 = scmp.ge.s32.totalorder %s30_s30, 2 }
  0x38   : > { %p73_p13 = scmp.ne.s32.totalorder %s785_s11, %s781_s10  ;;  %p79_p2 = scmp.ne.s32.totalorder %s781_s10, %s777_s9 }
  0x39   : > { %s1216_s30 = smov (%p31_p12, %s30_s30), 0  ;;  %s1218_s22 = smov (!%p31_p12, %s33_s22), %s813_s18 }
  0x3a   : > { %1192 = sst [smem:[#allocation14_spill]] %s1216_s30  ;;  %s63_s6 = ssub.s32 %s809_s17, %s1216_s30 }
  0x3b   : > { %p1193_p11 = scmp.eq.s32.totalorder %s817_s19, 0  ;;  %p35_p0 = scmp.ge.s32.totalorder %s1218_s22, 2 }
  0x3c   : > { %p64_p5 = scmp.eq.s32.totalorder %s63_s6, 0  ;;  %p1005_p10 = por %p79_p2, %p907_p3 }
  0x3d   : > { %p999_p7 = por %p73_p13, %p1193_p11  ;;  %s147_s9 = sand.u32 1, %s785_s11  }
  0x3e   : > { %s1195_s21 = scalar_select %p1005_p10, 1, 0 }
  0x3f   : > { %s1220_s22 = smov (%p35_p0, %s1218_s22), 0  ;;  %s488_s25 = sshll.u32 %s147_s9, 3 }
  0x40   : > { %s1013_s7 = scalar_select %p64_p5, %s785_s11, %s66_s4  }
  0x41   : > { %s37_s29 = ssub.s32 %s813_s18, %s1220_s22  ;;  %s489_s3 = sshll.u32 %s809_s17, 7 }
  0x42   : > { %p38_p4 = scmp.eq.s32.totalorder %s37_s29, 0  ;;  %s1026_s24 = scalar_lea.hbm %s1171_s1, %s489_s3 }
  0x43   : > { %s151_s30 = scalar_lea.vmem [#allocation7], %s488_s25  ;;  %p1196_p3 = scmp.lt.s32.totalorder %s817_s19, 4 }
  0x44   : > { %s1021_s5 = scalar_select %p38_p4, %s797_s14, %s40_s23  }
  0x45   : > { %s158_s28 = sshll.u32 %s151_s30, 4  ;;  %p1034_p1 = pnand %p1196_p3, %p999_p7  ;;  %s1028_s28 = int_to_ptr.vmem [resolvable:$true] %s158_s28 }
  0x46   : > { %s148_s23 = scalar_lea.sflag [#allocation8], %s147_s9  ;;  %s661_s0 = scalar_lea.hbm %s1026_s24, 128 }
  0x47   : > { %p662_p6 = scmp.ne.s32.totalorder %s1026_s24, %s661_s0  ;;  %p663_p8 = pneg %p1034_p1 }
  0x48   : > { %s666_s8 = scalar_lea.hbm %s1171_s1, 256  ;;  %p667_p2 = scmp.lt.u32.totalorder %s1026_s24, %s1171_s1 }
  0x49   : > { %p664_p12 = pnand %p663_p8, %p662_p6  ;;  %p668_p11 = scmp.lt.u32.totalorder %s666_s8, %s661_s0 }
  0x4a   : > { %p670_p0 = scmp.lt.u32.totalorder %s661_s0, %s1026_s24 }
  0x4b   : > { %p665_p13 = pneg %p664_p12  ;;  %p669_p7 = por %p668_p11, %p667_p2 }
  0x4d   : > { %p671_p5 = por %p670_p0, %p669_p7 }
  0x4f   : > { %p672_p4 = pnand %p671_p5, %p665_p13 }
  0x51   : > { %675 = shalt.err (!%p672_p4)
}
  0x52   : > { %s676_s9 = scalar_lea.vmem %s1028_s28, 128  ;;  %s820_s6 = smov [#allocation7]  }
  0x53   : > { %p677_p3 = scmp.ne.s32.totalorder %s1028_s28, %s676_s9  ;;  %s681_s30 = sshll.u32 %s820_s6, 4  ;;  %s682_s30 = int_to_ptr.vmem [resolvable:$false] %s681_s30 }
  0x54   : > { %s683_s29 = scalar_lea.vmem %s682_s30, 256  ;;  %p684_p10 = scmp.lt.s32.totalorder %s1028_s28, %s682_s30 }
  0x55   : > { %p679_p6 = pnand %p677_p3, %p663_p8  ;;  %p685_p2 = scmp.lt.s32.totalorder %s683_s29, %s676_s9 }
  0x57   : > { %p680_p12 = pneg %p679_p6  ;;  %p686_p11 = por %p685_p2, %p684_p10 }
  0x59   : > { %p687_p7 = pnand %p686_p11, %p680_p12 }
  0x5b   : > { %690 = shalt.err (!%p687_p7)
}
  0x5c   : > { %522 = dma.hbm_to_vmem [thread:$0]  (!%p1034_p1), %s1026_s24, 128, %s1028_s28, %s148_s23  }
  0x5d   : > { %167 = sbr.rel (%p980_p9) target bundleno = 1096 (0x448), region = 28  ;;  %s1066_s0 = sand.u32 (!%p980_p9), 1, %s793_s13  }
  0x5e   : > { %s491_s8 = sshll.u32 (!%p980_p9), %s1066_s0, 3  ;;  %s170_s25 = scalar_lea.sflag (!%p980_p9), [#allocation5], %s1066_s0 }
  0x5f   : > { %s173_s3 = scalar_lea.vmem (!%p980_p9), [#allocation4], %s491_s8  ;;  %p1198_p10 = scmp.ne.s32.totalorder (!%p980_p9), %s1183_s26, 0 }
  0x64   : > { %764 = dma.done.wait (%p1198_p10), %s170_s25, 128  }
  0x65   : > { %766 = vsyncadd (%p1198_p10), %s170_s25, 4294967168  ;;  %s178_s28 = sand.u32 1, %s781_s10   ;;  %p1199_p9 = scmp.ne.s32.totalorder %s1195_s21, 0 }
  0x66   : > { %s492_s24 = sshll.u32 %s178_s28, 3  ;;  %s179_s20 = scalar_lea.sflag [#allocation8], %s178_s28 }
  0x67   : > { %s182_s4 = scalar_lea.vmem [#allocation7], %s492_s24 }
  0x68   : > { %768 = dma.done.wait (%p1199_p9), %s179_s20, 128  }
  0x69   : > { %770 = vsyncadd (%p1199_p9), %s179_s20, 4294967168  ;;  %s1079_s23 = scalar_lea.vmem [#allocation9], %s491_s8  ;;  %p494_p1 = scmp.ne.s32.totalorder %s801_s15, 0 }
  0x6a   : > { %vm212_vm0 = vcmask (!%p494_p1), 7168   ;;  %v821_v0 = vmov (!%p494_p1), 0.0   ;;  %v822_v1 = vmov (!%p494_p1), -inf  }
  0x6b   : > { %211 = sbr.rel (%p494_p1) target bundleno = 114 (0x72), region = 40  ;;  %213 = vst.msk [vmem:[#allocation3] sm:$0xff] (!%p494_p1), %vm212_vm0, %v821_v0  ;;  %214 = vst.msk [vmem:[#allocation2] sm:$0xff] (!%p494_p1), %vm212_vm0, %v822_v1 }
  0x72 PF: > { %v216_v2 = vld [vmem:[%s182_s4] sm:$0xff]  ;;  %vm217_vm1 = vcmask 261120   ;;  %v823_v3 = vmov 0.0   ;;  %vm824_vm2 = vmmov 0   ;;  %v215_v4 = vld [vmem:[%s173_s3] sm:$0xff]  ;;  %vm296_vm3 = vcmask 64512   ;;  %p316_p8 = scmp.eq.s32.totalorder %s805_s16, %s801_s15 }
  0x73   : > { %505 = vmatprep.subr.mxu0 %v823_v3  ;;  %507 = vmatprep.mubr.msk.f32.mxu0 %vm824_vm2, %v823_v3  ;;  %v825_v9 = vmov 0   ;;  %v295_v10 = vld [vmem:[#allocation2] sm:$0xff]  ;;  %vm314_vm4 = vcmask 7168   ;;  %p317_p13 = scmp.eq.s32.totalorder %s801_s15, 1  ;;  %v312_v15 = vld [vmem:[#allocation3] sm:$0xff] }
  0x74   : > { %506 = vmatpush3.xpose.msk.msra.mxu0 %vm217_vm1, %v216_v2  ;;  %623 = vset.pattern.permute.xlu0 %v825_v9 }
  0x75   : > { %p1090_p0 = por %p317_p13, %p316_p8 }
  0x76   : > { %v322_v22 = vlaneseq (%p1090_p0)  ;;  %s497_s9 = sshll.u32 (%p1090_p0), %s801_s15, 3 }
  0x77   : > { %508 = vmatmul.mubr.msk.f32.vlgmr.msra.gmra.mrb[0].mxu0 %vm217_vm1, %v215_v4  ;;  %v332_v26 = vstv (%p1090_p0), %s497_s9 }
  0x78   : > { %v323_v23 = vshrl.u32 (%p1090_p0), %v322_v22, 7  ;;  %v325_v24 = vand.u32 (%p1090_p0), 127, %v322_v22 }
  0x7a   : > { %vm326_vm6 = vcmp.eq.s32.totalorder (%p1090_p0), %v323_v23, %v325_v24  ;;  %v333_v27 = vadd.s32 (%p1090_p0), %v332_v26, %v325_v24 }
  0x7c   : > { %vm334_vm8 = vcmp.ge.s32.totalorder (%p1090_p0), %v333_v27, 10 }
 0x14a   : > { %v290_v5 = vpop.f32.mrb[0].mxu0 }
 0x14b   : > { %v294_v6 = vmul.f32 14.285714, %v290_v5  ;;  %v509_v7 = vpop.f32.mrb[1].mxu0 }
 0x14d   : > { %v297_v8 = vsel %vm296_vm3, %v294_v6, -inf }
 0x14e   : > { %298 = vmax.xlane.f32.xlu0 %v297_v8 }
 0x1db   : > { %v299_v11 = vpop.xlane.xlu0 %298 }
 0x1dc   : > { %v300_v12 = vmax.f32 %v295_v10, %v299_v11 }
 0x1de   : > { %v309_v13 = vsub.f32 %v295_v10, %v300_v12  ;;  %315 = vst.msk [vmem:[#allocation2] sm:$0xff] %vm314_vm4, %v300_v12  ;;  %303 = vperm.xlu0 %623, %v300_v12  }
 0x1e0   : > { %v310_v14 = vmul.f32 1.442695, %v309_v13 }
 0x1e2   : > { %624 = vpow2.f32 %v310_v14 }
 0x1ec   : > { %v625_v16 = vpop.eup %624 }
 0x1ed   : > { %v313_v17 = vmul.f32 %v625_v16, %v312_v15 }
 0x25d   : > { %v304_v18 = vpop.permute.xlu0 %303 }
 0x25e   : > { %v306_v19 = vsub.f32 %v294_v6, %v304_v18 }
 0x260   : > { %v307_v20 = vmul.f32 1.442695, %v306_v19 }
 0x262   : > { %626 = vpow2.f32 %v307_v20 }
 0x266   : > { %321 = sbr.rel (!%p1090_p0) target bundleno = 774 (0x306), region = 44 }
 0x26c   : > { %v627_v21 = vpop.eup %626 }
 0x26d   : > { %s327_s21 = scalar_select %p316_p8, 1, 0 }
 0x26f   : > { %v328_v25 = vstv %s327_s21 }
 0x270   : > { %vm329_vm5 = vcmp.eq.s32.totalorder %v328_v25, 1 }
 0x271   : > { %vm330_vm7 = vmand %vm329_vm5, %vm326_vm6 }
 0x272   : > { %vm335_vm9 = vmor %vm330_vm7, %vm334_vm8 }
 0x273   : > { %v336_v28 = vsel %vm335_vm9, 0.0, %v627_v21 }
 0x274   : > { %v337_v29 = vsel %vm296_vm3, %v336_v28, 0.0 }
 0x275   : > { %338 = vadd.xlane.f32.xlu0 %v337_v29 }
 0x302   : > { %v339_v30 = vpop.xlane.xlu0 %338 }
 0x303   : > { %v340_v31 = vadd.f32 %v339_v30, %v313_v17 }
 0x305   : > { %341 = vst.msk [vmem:[#allocation3] sm:$0xff] %vm314_vm4, %v340_v31 }
 0x306 PF: > { %344 = sbr.rel (%p1090_p0) target bundleno = 920 (0x398), region = 48  ;;  %v345_v32 = vsel (!%p1090_p0), %vm296_vm3, %v627_v21, 0.0 }
 0x307   : > { %346 = vadd.xlane.f32.xlu0 (!%p1090_p0), %v345_v32 }
 0x394   : > { %v347_v33 = vpop.xlane.xlu0 %346 }
 0x395   : > { %v348_v34 = vadd.f32 %v347_v33, %v313_v17 }
 0x397   : > { %349 = vst.msk [vmem:[#allocation3] sm:$0xff] %vm314_vm4, %v348_v34 }
 0x398 PF: > { %p498_p5 = scmp.ne.s32.totalorder %s801_s15, 1 }
 0x399   : > { %v826_v36 = vmov (!%p498_p5), 0   ;;  %v353_v38 = vld [vmem:[#allocation2] sm:$0xff] (!%p498_p5) }
 0x39a   : > { %352 = sbr.rel (%p498_p5) target bundleno = 1071 (0x42f), region = 52  ;;  %628 = vset.pattern.permute.xlu0 (!%p498_p5), %v826_v36 }
 0x39e   : > { %v354_v35 = vld [vmem:[#allocation3] sm:$0xff] (!%p498_p5) }
 0x39f   : > { %629 = vlog2.f32 (!%p498_p5), %v354_v35 }
 0x3a9   : > { %v630_v37 = vpop.eup %629 }
 0x3aa   : > { %v356_v39 = vmul.f32 0.6931472, %v630_v37 }
 0x3ac   : > { %v357_v40 = vadd.f32 %v356_v39, %v353_v38 }
 0x3ae   : > { %360 = vperm.xlu0 %628, %v357_v40  }
 0x42d   : > { %v361_v41 = vpop.permute.xlu0 %360 }
 0x42e   : > { %363 = vst [vmem:[%s1079_s23] sm:$0xff] %v361_v41 }
 0x42f PF: > { %s500_s6 = sshll.u32 %s805_s16, 7  ;;  %s378_s8 = sshll.u32 %s1079_s23, 4  ;;  %s379_s8 = int_to_ptr.vmem [resolvable:$true] %s378_s8 }
 0x430   : > { %s1112_s29 = scalar_lea.hbm %s1172_s2, %s500_s6  ;;  %s365_s25 = scalar_lea.sflag [#allocation6], %s1066_s0 }
 0x431   : > { %s691_s3 = scalar_lea.vmem %s379_s8, 128  ;;  %p1201_p3 = scmp.ne.s32.totalorder %s1184_s27, 0 }
 0x432   : > { %p692_p4 = scmp.ne.s32.totalorder %s379_s8, %s691_s3  ;;  %s827_s28 = smov [#allocation9]  }
 0x433   : > { %s695_s24 = sshll.u32 %s827_s28, 4  ;;  %s696_s24 = int_to_ptr.vmem [resolvable:$false] %s695_s24 }
 0x434   : > { %p693_p6 = pnand %p692_p4, %p1201_p3  ;;  %s697_s20 = scalar_lea.vmem %s696_s24, 256 }
 0x435   : > { %p698_p2 = scmp.lt.s32.totalorder %s379_s8, %s696_s24  ;;  %p699_p11 = scmp.lt.s32.totalorder %s697_s20, %s691_s3 }
 0x436   : > { %p694_p12 = pneg %p693_p6 }
 0x437   : > { %p700_p7 = por %p699_p11, %p698_p2 }
 0x439   : > { %p701_p10 = pnand %p700_p7, %p694_p12 }
 0x43b   : > { %704 = shalt.err (!%p701_p10)
}
 0x43c   : > { %s705_s16 = scalar_lea.hbm %s1112_s29, 128  ;;  %s709_s23 = scalar_lea.hbm %s1172_s2, 256 }
 0x43d   : > { %p706_p9 = scmp.ne.s32.totalorder %s1112_s29, %s705_s16  ;;  %p710_p13 = scmp.lt.u32.totalorder %s1112_s29, %s1172_s2 }
 0x43e   : > { %p711_p0 = scmp.lt.u32.totalorder %s709_s23, %s705_s16  ;;  %p713_p4 = scmp.lt.u32.totalorder %s705_s16, %s1112_s29 }
 0x43f   : > { %p707_p1 = pnand %p706_p9, %p1201_p3 }
 0x440   : > { %p712_p5 = por %p711_p0, %p710_p13 }
 0x441   : > { %p708_p8 = pneg %p707_p1 }
 0x442   : > { %p714_p6 = por %p713_p4, %p712_p5 }
 0x444   : > { %p715_p12 = pnand %p714_p6, %p708_p8 }
 0x446   : > { %718 = shalt.err (!%p715_p12)
}
 0x447   : > { %514 = dma.vmem_to_hbm [thread:$0]  (%p1201_p3), %s379_s8, 128, %s1112_s29, %s365_s25  }
 0x448 PF: > { %s1202_s9 = sld [smem:[#allocation13_spill]]  ;;  %p528_p2 = scmp.ge.s32.totalorder %s817_s19, 2 }
 0x449   : > { %s390_s6 = sand.u32 1, %s789_s12  }
 0x44a   : > { %s391_s15 = scalar_lea.sflag [#allocation6], %s390_s6 }
 0x44e   : > { %p1203_p11 = scmp.ne.s32.totalorder %s1202_s9, 0 }
 0x450   : > { %p524_p7 = pnand %p528_p2, %p1203_p11 }
 0x452   : > { %772 = dma.done.wait (!%p524_p7), %s391_s15, 128  }
 0x453   : > { %774 = vsyncadd (!%p524_p7), %s391_s15, 4294967168  ;;  %s21_s19 = sadd.s32 1, %s817_s19   ;;  %s1204_s27 = sld [smem:[#allocation14_spill]] }
 0x454   : > { %p18_p10 = scmp.ge.s32.totalorder %s21_s19, 6   ;;  %s1205_s9 = smov %s781_s10 }
 0x455   : > { %s1206_s10 = smov %s785_s11  ;;  %s1207_s11 = smov %s1013_s7 }
 0x456   : > { %s1208_s12 = smov %s793_s13  ;;  %s1209_s13 = smov %s797_s14 }
 0x457   : > { %s1210_s14 = smov %s1021_s5  ;;  %s1211_s15 = smov %s809_s17 }
 0x458   : > { %s1212_s16 = smov %s813_s18  ;;  %s1214_s18 = smov %s1220_s22 }
 0x459   : > { %s1213_s17 = smov %s1204_s27  ;;  %20 = sbr.rel (!%p18_p10) target bundleno = 13 (0xd), region = 102 }
 0x460   :  { %396 = vsyncpa [#allocation5], 1 }
 0x461   :  { %398 = vsyncpa [#allocation5 + $0x1], 1 }
 0x462   :  { %399 = vsyncpa [#allocation8], 1 }
 0x463   :  { %401 = vsyncpa [#allocation8 + $0x1], 1 }
 0x464   :  { %402 = vsyncpa [#allocation6], 1 }
 0x465   :  { %404 = vsyncpa [#allocation6 + $0x1], 1 }

</bundles_post_ra>
